<compile_context>
chip_gen: v5e
topology: v5e:2x2
jax: 0.10.0
libtpu: 0.0.40
codegen_flags: <defaults>
</compile_context>

<pallas_src>
import jax
import jax.numpy as jnp
from jax.experimental import pallas as pl
from jax.experimental.pallas import tpu as pltpu


def _head_kernel(x_ref, w_ref, b_ref, o_ref):
    # x_ref: (tb, H)  last-timestep activations (batch on sublanes, H on lanes)
    # w_ref: (1, H)   lane-dense weight row (constant block index -> stays in VMEM)
    # b_ref: (1,)     bias scalar in SMEM
    # o_ref: (tb, 1)  output block
    x = jnp.maximum(x_ref[...].astype(jnp.float32), 0.0)      # ReLU on the VPU
    xw = x * w_ref[...].astype(jnp.float32)                   # per-lane multiply (VPU)
    y = jnp.sum(xw, axis=-1, keepdims=True)                   # cross-lane reduce (XLU)
    o_ref[...] = (y + b_ref[0]).astype(o_ref.dtype)


def _batch_tile(batch: int, hidden: int, itemsize: int,
                budget_bytes: int = 4 << 20) -> int:
    """Rows per batch block: whole batch if it fits the per-buffer budget,
    otherwise a multiple of 8 sized so one double-buffered input tile stays
    well under the default scoped-VMEM limits (v5e 16 MiB / v6e,v7x 32 MiB)."""
    rows = max(8, (budget_bytes // max(1, hidden * itemsize)) // 8 * 8)
    return batch if batch <= rows else rows


def _head_call(x_operand, x_spec, weight_f32, bias_f32, batch, tb, out_dtype):
    hidden = weight_f32.shape[1]
    return pl.pallas_call(
        _head_kernel,
        out_shape=jax.ShapeDtypeStruct((batch, 1), out_dtype),
        grid=(pl.cdiv(batch, tb),),
        in_specs=[
            x_spec,
            pl.BlockSpec((1, hidden), lambda i: (0, 0)),
            pl.BlockSpec(memory_space=pltpu.MemorySpace.SMEM),
        ],
        out_specs=pl.BlockSpec((tb, 1), lambda i: (i, 0)),
        compiler_params=pltpu.CompilerParams(
            dimension_semantics=("parallel",)),
    )(x_operand, weight_f32, bias_f32)


def linear_regression_head(lstm_output: jax.Array,
                           weight: jax.Array,
                           bias: jax.Array) -> jax.Array:
    """lstm_output: (B, S, H); weight: (1, H); bias: (1,) -> (B, 1)."""
    assert lstm_output.ndim == 3, (
        "input shape for a Linear Regression head expected to be "
        f"(batch size, seq len, lstm hidden size), but got shape = {lstm_output.shape}"
    )
    B, S, H = lstm_output.shape
    assert weight.shape == (1, H), weight.shape
    assert bias.shape == (1,), bias.shape

    w = weight.astype(jnp.float32)     # keep lane-dense (1, H); no transpose needed
    b = bias.astype(jnp.float32)       # (1,) scalar -> SMEM
    out_dtype = lstm_output.dtype
    tb = _batch_tile(B, H, itemsize=lstm_output.dtype.itemsize)

    # Preferred path: fuse the [:, -1, :] slice into the Pallas DMA by blocking
    # the full (B, S, H) array with a squeezed seq dim pinned at block S - 1
    # (block size 1 along that axis, so block index == element index).
    fused_spec = pl.BlockSpec((tb, None, H), lambda i: (i, S - 1, 0))
    try:
        return _head_call(lstm_output, fused_spec, w, b, B, tb, out_dtype)
    except Exception:
        # TODO(synk): fallback for Pallas builds that reject a squeezed size-1
        # second-to-last block dim; slices in XLA first (one extra B*H HBM
        # round trip), then runs the same 2-D kernel.
        x_last = lstm_output[:, -1, :]
        sliced_spec = pl.BlockSpec((tb, H), lambda i: (i, 0))
        return _head_call(x_last, sliced_spec, w, b, B, tb, out_dtype)


def _reference(lstm_output, weight, bias):
    x_last = lstm_output[:, -1, :]
    return jnp.maximum(x_last, 0.0) @ weight.T + bias[None, :]


if __name__ == "__main__":
    # Small shapes consistent with (batch, seq, hidden) LSTM output.
    B, S, H = 2, 8, 32

    key = jax.random.PRNGKey(0)
    k_x, k_w, k_b = jax.random.split(key, 3)

    lstm_output = jax.random.normal(k_x, (B, S, H), dtype=jnp.float32)

    # Deterministic parameter init mimicking torch.nn.Linear(H, 1):
    # U(-1/sqrt(H), 1/sqrt(H)) for both weight and bias.
    bound = 1.0 / jnp.sqrt(jnp.float32(H))
    weight = jax.random.uniform(k_w, (1, H), jnp.float32, -bound, bound)  # (out=1, in=H)
    bias = jax.random.uniform(k_b, (1,), jnp.float32, -bound, bound)      # (out=1,)

    out = linear_regression_head(lstm_output, weight, bias)
    out = jax.block_until_ready(out)

    ref = _reference(lstm_output, weight, bias)
    assert out.shape == (B, 1), out.shape
    assert jnp.allclose(out, ref, atol=1e-5, rtol=1e-5), (out, ref)

    print("KERNEL_OK")
</pallas_src>

<mosaic_0001>
module attributes {stable_mosaic.version = 11 : i64} {
  func.func @_head_kernel(%arg0: i32, %arg1: memref<2x32xf32, #tpu.memory_space<vmem>>, %arg2: memref<1x32xf32, #tpu.memory_space<vmem>>, %arg3: memref<1xf32, #tpu.memory_space<smem>>, %arg4: memref<2x1xf32, #tpu.memory_space<vmem>>) attributes {dimension_semantics = [#tpu.dimension_semantics<parallel>], iteration_bounds = array<i64: 1>, scalar_prefetch = 0 : i64, scratch_operands = 0 : i64, tpu.core_type = #tpu.core_type<tc>, window_params = [{transform_indices = @transform_0, window_bounds = array<i64: 2, 32>}, {pipeline_mode = #tpu.pipeline_mode<synchronous>, transform_indices = @transform_1, window_bounds = array<i64: 1, 32>}, {transform_indices = @transform_2, window_bounds = array<i64: 1>}, {transform_indices = @transform_3, window_bounds = array<i64: 2, 1>}]} {
    %c0 = arith.constant 0 : index
    %c0_0 = arith.constant 0 : index
    %0 = vector.load %arg1[%c0, %c0_0] : memref<2x32xf32, #tpu.memory_space<vmem>>, vector<2x32xf32>
    %cst = arith.constant 0.000000e+00 : f32
    %1 = vector.broadcast %cst : f32 to vector<2x32xf32>
    %2 = arith.maximumf %0, %1 : vector<2x32xf32>
    %c0_1 = arith.constant 0 : index
    %c0_2 = arith.constant 0 : index
    %3 = vector.load %arg2[%c0_1, %c0_2] : memref<1x32xf32, #tpu.memory_space<vmem>>, vector<1x32xf32>
    %4 = vector.broadcast %3 : vector<1x32xf32> to vector<2x32xf32>
    %5 = arith.mulf %2, %4 : vector<2x32xf32>
    %cst_3 = arith.constant dense<0.000000e+00> : vector<2xf32>
    %6 = vector.multi_reduction <add>, %5, %cst_3 [1] : vector<2x32xf32> to vector<2xf32>
    %7 = vector.shape_cast %6 : vector<2xf32> to vector<2x1xf32>
    %c0_4 = arith.constant 0 : index
    %8 = memref.load %arg3[%c0_4] : memref<1xf32, #tpu.memory_space<smem>>
    %9 = vector.broadcast %8 : f32 to vector<2x1xf32>
    %10 = arith.addf %7, %9 : vector<2x1xf32>
    %c0_5 = arith.constant 0 : index
    %c0_6 = arith.constant 0 : index
    %11 = vector.load %arg4[%c0_5, %c0_6] : memref<2x1xf32, #tpu.memory_space<vmem>>, vector<2x1xf32>
    tpu.vector_store %arg4[%c0_5, %c0_6], %10 {strides = array<i32>} : memref<2x1xf32, #tpu.memory_space<vmem>>, vector<2x1xf32>,
    return
  }
  func.func @transform_0(%arg0: i32) -> (i32, i32) {
    %c0_i32 = arith.constant 0 : i32
    %c0_i32_0 = arith.constant 0 : i32
    return %arg0, %c0_i32 : i32, i32
  }
  func.func @transform_1(%arg0: i32) -> (i32, i32) {
    %c0_i32 = arith.constant 0 : i32
    %c0_i32_0 = arith.constant 0 : i32
    %c0_i32_1 = arith.constant 0 : i32
    return %c0_i32, %c0_i32_0 : i32, i32
  }
  func.func @transform_2(%arg0: i32) -> i32 {
    %c0_i32 = arith.constant 0 : i32
    %c0_i32_0 = arith.constant 0 : i32
    return %c0_i32 : i32
  }
  func.func @transform_3(%arg0: i32) -> (i32, i32) {
    %c0_i32 = arith.constant 0 : i32
    %c0_i32_0 = arith.constant 0 : i32
    return %arg0, %c0_i32 : i32, i32
  }
}

</mosaic_0001>

<bundles_post_ra>
// kernel: tpu_custom_call.1
= control target key start
LH: loop header
LB: loop body
LE: loop exit
PB: predicated region body
PF: predicated region fallthrough
CT: control target
= control target key end

     0   :  { %9 = vsyncpa [#allocation4], 0  ;;  %s78_s15 = smov [#allocation3]   ;;  %s111_s0 = inlined_call_operand.vmem [shape: f32[2,32], index: 0, kind: input, shape index: {}]   ;;  %s112_s1 = inlined_call_operand.hbm [shape: f32[1,32], index: 1, kind: input, shape index: {}]   ;;  %s113_s2 = inlined_call_operand.<no memory space> [shape: f32[1], index: 2, kind: input, shape index: {}]   ;;  %s114_s3 = inlined_call_operand.vmem [shape: f32[2,1], index: 3, kind: output, shape index: {}]  }
   0x1   :  { %s17_s14 = sshll.u32 %s112_s1, 4  ;;  %s19_s16 = sshll.u32 %s78_s15, 4  ;;  %s18_s14 = int_to_ptr.hbm [resolvable:$true] %s17_s14  ;;  %s20_s16 = int_to_ptr.vmem [resolvable:$true] %s19_s16 }
   0x2   :  { %22 = dma.hbm_to_vmem [thread:$0]  %s18_s14, 16, %s20_s16, [#allocation4]  }
   0x3   :  { %76 = dma.done.wait [#allocation4], 16  }
   0x4   :  { %77 = vsyncadd [#allocation4], 4294967280  ;;  %v29_v0 = vld [vmem:[%s111_s0] sm:$0x3]  ;;  %vm36_vm0 = vcmask 254976   ;;  %v41_v5 = vstv %s113_s2  ;;  %vm43_vm1 = vcmask 1024  }
   0x5   :  { %v51_v1 = vld [vmem:[#allocation3] ss:$0 sm:$0xff]  ;;  %v30_v2 = vmax.f32 %v29_v0, 0.0 }
   0x7   :  { %v35_v3 = vmul.f32 %v51_v1, %v30_v2 }
   0x9   :  { %v37_v4 = vsel %vm36_vm0, %v35_v3, 0.0 }
   0xa   :  { %38 = vadd.xlane.f32.xlu0 %v37_v4 }
  0x7d   :  { %v39_v6 = vpop.xlane.xlu0 %38 }
  0x7e   :  { %v42_v7 = vadd.f32 %v41_v5, %v39_v6 }
  0x80   :  { %44 = vst.msk [vmem:[%s114_s3] sm:$0x3] %vm43_vm1, %v42_v7 }
  0x81   :  { %49 = vsyncpa [#allocation4], 1 }

</bundles_post_ra>
